<compile_context>
chip_gen: v6e
topology: v6e:2x2x1
jax: 0.10.0
libtpu: 0.0.40
codegen_flags: <defaults>
</compile_context>

<pallas_src>
import jax
import jax.numpy as jnp
from jax.experimental import pallas as pl
from jax.experimental.pallas import tpu as pltpu

HIDDEN = 128  # hidden_num_2 in the PyTorch module


def _output_model_kernel(q_ref, w1_ref, b1_ref, w2_ref, b2_ref, o_ref):
    # q_ref : [D, TB]     query tile, batch in the lane dimension
    # w1_ref: [H, D]      fc1.weight (PyTorch orientation), VMEM-resident
    # b1_ref: [H, 1]      fc1.bias as a column
    # w2_ref: [H, 1]      fc2.weight as a column
    # b2_ref: [1, 1]      fc2.bias + threshold * sum(fc2.weight)
    # o_ref : [1, 1, TB]  lane-dense output row for this batch tile
    h = jnp.dot(w1_ref[...], q_ref[...],
                preferred_element_type=jnp.float32)            # [H, TB]  (MXU)
    h = jnp.maximum(h + b1_ref[...], 0.0)                      # bias + ReLU (VPU)
    # fc2 has output width 1: do it as multiply + sublane reduce (VPU/XLU)
    # instead of a degenerate N=1 MXU matmul; result is already lane-dense.
    row = jnp.sum(h * w2_ref[...], axis=0, keepdims=True)      # [1, TB]
    o_ref[0] = row + b2_ref[...]


def output_model_forward(queries, threshold, fc1_w, fc1_b, fc2_w, fc2_b):
    """queries: [B, D] f32, threshold: scalar.
    fc1_w: [H, D], fc1_b: [H], fc2_w: [1, H], fc2_b: [1]  (PyTorch layout).
    Returns [B, 1] f32."""
    queries = jnp.asarray(queries, jnp.float32)
    B, D = queries.shape
    H = fc1_w.shape[0]
    thr = jnp.asarray(threshold, jnp.float32)

    # Lane-dense batch tile (multiple of 128). Tiles >=512 amortize the
    # ~0.35 us per-grid-step overhead; the 1024 cap keeps each double-buffered
    # block at ~128 KiB of queries + ~17 KiB resident weights, well inside
    # v7x's 64 MiB physical / 32 MiB scoped VMEM.
    TB = min(1024, ((B + 127) // 128) * 128)
    num_tiles = pl.cdiv(B, TB)
    B_pad = num_tiles * TB

    # Layout plumbing (wrapper-side): pad batch, put batch on the lanes.
    q_t = jnp.pad(queries, ((0, B_pad - B), (0, 0))).T          # [D, B_pad]

    w1 = jnp.asarray(fc1_w, jnp.float32)                        # [H, D]
    b1 = jnp.asarray(fc1_b, jnp.float32).reshape(H, 1)          # [H, 1]
    w2 = jnp.asarray(fc2_w, jnp.float32).reshape(H, 1)          # [H, 1]
    # Fold "+ threshold" into the fc2 bias (exact up to f32 reassociation).
    b2_eff = (jnp.asarray(fc2_b, jnp.float32).reshape(())
              + thr * jnp.sum(w2)).reshape(1, 1)                # [1, 1]

    out = pl.pallas_call(
        _output_model_kernel,
        out_shape=jax.ShapeDtypeStruct((num_tiles, 1, TB), jnp.float32),
        grid=(num_tiles,),
        in_specs=[
            pl.BlockSpec((D, TB), lambda i: (0, i)),     # streamed query tiles
            pl.BlockSpec((H, D), lambda i: (0, 0)),      # resident fc1 weight
            pl.BlockSpec((H, 1), lambda i: (0, 0)),      # resident fc1 bias
            pl.BlockSpec((H, 1), lambda i: (0, 0)),      # resident fc2 weight
            pl.BlockSpec((1, 1), lambda i: (0, 0)),      # folded fc2 bias
        ],
        out_specs=pl.BlockSpec((1, 1, TB), lambda i: (i, 0, 0)),
        compiler_params=pltpu.CompilerParams(
            dimension_semantics=("parallel",)),
    )(q_t, w1, b1, w2, b2_eff)

    return out.reshape(B_pad, 1)[:B]


def reference_forward(queries, threshold, fc1_w, fc1_b, fc2_w, fc2_b):
    out1 = jax.nn.relu(queries @ fc1_w.T + fc1_b)
    out2 = out1 + threshold
    return out2 @ fc2_w.T + fc2_b


if __name__ == "__main__":
    key = jax.random.PRNGKey(0)
    B, D = 8, 32  # small synthetic shapes; inputs_dim = 32

    k_q, k_w1, k_b1, k_w2, k_b2 = jax.random.split(key, 5)
    queries = jax.random.normal(k_q, (B, D), dtype=jnp.float32)
    threshold = jnp.float32(0.5)

    # Deterministic parameter init (PyTorch Linear-style uniform bounds).
    bound1 = 1.0 / jnp.sqrt(D)
    fc1_w = jax.random.uniform(k_w1, (HIDDEN, D), jnp.float32, -bound1, bound1)
    fc1_b = jax.random.uniform(k_b1, (HIDDEN,), jnp.float32, -bound1, bound1)
    bound2 = 1.0 / jnp.sqrt(HIDDEN)
    fc2_w = jax.random.uniform(k_w2, (1, HIDDEN), jnp.float32, -bound2, bound2)
    fc2_b = jax.random.uniform(k_b2, (1,), jnp.float32, -bound2, bound2)

    out = output_model_forward(queries, threshold, fc1_w, fc1_b, fc2_w, fc2_b)
    out = jax.block_until_ready(out)

    ref = reference_forward(queries, threshold, fc1_w, fc1_b, fc2_w, fc2_b)
    assert out.shape == (B, 1)
    assert jnp.allclose(out, ref, atol=2e-5, rtol=2e-5), \
        float(jnp.max(jnp.abs(out - ref)))
    print("KERNEL_OK")
</pallas_src>

<mosaic_0001>
module attributes {stable_mosaic.version = 11 : i64} {
  func.func @_output_model_kernel(%arg0: i32, %arg1: memref<32x128xf32, #tpu.memory_space<vmem>>, %arg2: memref<128x32xf32, #tpu.memory_space<vmem>>, %arg3: memref<128x1xf32, #tpu.memory_space<vmem>>, %arg4: memref<128x1xf32, #tpu.memory_space<vmem>>, %arg5: memref<1x1xf32, #tpu.memory_space<vmem>>, %arg6: memref<1x1x128xf32, #tpu.memory_space<vmem>>) attributes {dimension_semantics = [#tpu.dimension_semantics<parallel>], iteration_bounds = array<i64: 1>, scalar_prefetch = 0 : i64, scratch_operands = 0 : i64, tpu.core_type = #tpu.core_type<tc>, window_params = [{transform_indices = @transform_0, window_bounds = array<i64: 32, 128>}, {pipeline_mode = #tpu.pipeline_mode<synchronous>, transform_indices = @transform_1, window_bounds = array<i64: 128, 32>}, {pipeline_mode = #tpu.pipeline_mode<synchronous>, transform_indices = @transform_2, window_bounds = array<i64: 128, 1>}, {pipeline_mode = #tpu.pipeline_mode<synchronous>, transform_indices = @transform_3, window_bounds = array<i64: 128, 1>}, {pipeline_mode = #tpu.pipeline_mode<synchronous>, transform_indices = @transform_4, window_bounds = array<i64: 1, 1>}, {transform_indices = @transform_5, window_bounds = array<i64: 1, 1, 128>}]} {
    %c0 = arith.constant 0 : index
    %c0_0 = arith.constant 0 : index
    %0 = vector.load %arg2[%c0, %c0_0] : memref<128x32xf32, #tpu.memory_space<vmem>>, vector<128x32xf32>
    %c0_1 = arith.constant 0 : index
    %c0_2 = arith.constant 0 : index
    %1 = vector.load %arg1[%c0_1, %c0_2] : memref<32x128xf32, #tpu.memory_space<vmem>>, vector<32x128xf32>
    %cst = arith.constant dense<0.000000e+00> : vector<128x128xf32>
    %2 = tpu.matmul %0, %1, %cst {dimension_numbers = #tpu.dot_dimension_numbers<[1], [0], [0], [1], [0, 0, 1, 1], [], []>} : vector<128x32xf32>, vector<32x128xf32>, vector<128x128xf32> -> vector<128x128xf32>
    %c0_3 = arith.constant 0 : index
    %c0_4 = arith.constant 0 : index
    %3 = vector.load %arg3[%c0_3, %c0_4] : memref<128x1xf32, #tpu.memory_space<vmem>>, vector<128x1xf32>
    %4 = vector.broadcast %3 : vector<128x1xf32> to vector<128x128xf32>
    %5 = arith.addf %2, %4 : vector<128x128xf32>
    %cst_5 = arith.constant 0.000000e+00 : f32
    %6 = vector.broadcast %cst_5 : f32 to vector<128x128xf32>
    %7 = arith.maximumf %5, %6 : vector<128x128xf32>
    %c0_6 = arith.constant 0 : index
    %c0_7 = arith.constant 0 : index
    %8 = vector.load %arg4[%c0_6, %c0_7] : memref<128x1xf32, #tpu.memory_space<vmem>>, vector<128x1xf32>
    %9 = vector.broadcast %8 : vector<128x1xf32> to vector<128x128xf32>
    %10 = arith.mulf %7, %9 : vector<128x128xf32>
    %cst_8 = arith.constant dense<0.000000e+00> : vector<128xf32>
    %11 = vector.multi_reduction <add>, %10, %cst_8 [0] : vector<128x128xf32> to vector<128xf32>
    %12 = vector.shape_cast %11 : vector<128xf32> to vector<1x128xf32>
    %c0_9 = arith.constant 0 : index
    %c0_10 = arith.constant 0 : index
    %13 = vector.load %arg5[%c0_9, %c0_10] : memref<1x1xf32, #tpu.memory_space<vmem>>, vector<1x1xf32>
    %14 = vector.broadcast %13 : vector<1x1xf32> to vector<1x128xf32>
    %15 = arith.addf %12, %14 : vector<1x128xf32>
    %c0_11 = arith.constant 0 : index
    %c0_12 = arith.constant 0 : index
    %c0_13 = arith.constant 0 : index
    %16 = vector.load %arg6[%c0_11, %c0_12, %c0_13] : memref<1x1x128xf32, #tpu.memory_space<vmem>>, vector<1x1x128xf32>
    %17 = vector.shape_cast %16 : vector<1x1x128xf32> to vector<1x128xf32>
    %18 = vector.shape_cast %15 : vector<1x128xf32> to vector<1x1x128xf32>
    tpu.vector_store %arg6[%c0_11, %c0_12, %c0_13], %18 {strides = array<i32>} : memref<1x1x128xf32, #tpu.memory_space<vmem>>, vector<1x1x128xf32>,
    return
  }
  func.func @transform_0(%arg0: i32) -> (i32, i32) {
    %c0_i32 = arith.constant 0 : i32
    %c0_i32_0 = arith.constant 0 : i32
    return %c0_i32, %arg0 : i32, i32
  }
  func.func @transform_1(%arg0: i32) -> (i32, i32) {
    %c0_i32 = arith.constant 0 : i32
    %c0_i32_0 = arith.constant 0 : i32
    %c0_i32_1 = arith.constant 0 : i32
    return %c0_i32, %c0_i32_0 : i32, i32
  }
  func.func @transform_2(%arg0: i32) -> (i32, i32) {
    %c0_i32 = arith.constant 0 : i32
    %c0_i32_0 = arith.constant 0 : i32
    %c0_i32_1 = arith.constant 0 : i32
    return %c0_i32, %c0_i32_0 : i32, i32
  }
  func.func @transform_3(%arg0: i32) -> (i32, i32) {
    %c0_i32 = arith.constant 0 : i32
    %c0_i32_0 = arith.constant 0 : i32
    %c0_i32_1 = arith.constant 0 : i32
    return %c0_i32, %c0_i32_0 : i32, i32
  }
  func.func @transform_4(%arg0: i32) -> (i32, i32) {
    %c0_i32 = arith.constant 0 : i32
    %c0_i32_0 = arith.constant 0 : i32
    %c0_i32_1 = arith.constant 0 : i32
    return %c0_i32, %c0_i32_0 : i32, i32
  }
  func.func @transform_5(%arg0: i32) -> (i32, i32, i32) {
    %c0_i32 = arith.constant 0 : i32
    %c0_i32_0 = arith.constant 0 : i32
    %c0_i32_1 = arith.constant 0 : i32
    return %arg0, %c0_i32, %c0_i32_0 : i32, i32, i32
  }
}

</mosaic_0001>

<bundles_post_ra>
// kernel: tpu_custom_call.1
= control target key start
LH: loop header
LB: loop body
LE: loop exit
PB: predicated region body
PF: predicated region fallthrough
CT: control target
= control target key end

     0   :  { %s820_s0 = inlined_call_operand.vmem [shape: f32[32,128], index: 0, kind: input, shape index: {}]   ;;  %s821_s1 = inlined_call_operand.vmem [shape: f32[128,32], index: 1, kind: input, shape index: {}]   ;;  %s822_s2 = inlined_call_operand.vmem [shape: f32[128,1], index: 2, kind: input, shape index: {}]   ;;  %s823_s3 = inlined_call_operand.vmem [shape: f32[128,1], index: 3, kind: input, shape index: {}]   ;;  %s824_s4 = inlined_call_operand.<no memory space> [shape: f32[1,1], index: 4, kind: input, shape index: {}]   ;;  %s825_s5 = inlined_call_operand.hbm [shape: f32[1,1,128], index: 5, kind: output, shape index: {}]  }
   0x1   :  { %v10_v0 = vstv %s824_s4 }
   0x2   :  { %11 = vst [vmem:[#allocation2] sm:$0x1] %v10_v0 }
   0x3   :  { %v42_v1 = vld [vmem:[%s820_s0 + $0x18] sm:$0xff]  ;;  %v45_v2 = vld [vmem:[%s822_s2 + $0x10] sm:$0xff]  ;;  %v43_v3 = vld [vmem:[%s822_s2] sm:$0xff]  ;;  %v610_v4 = vmov 0   ;;  %vm139_vm0 = vcmask 261120  }
   0x4   :  { %587 = vset.pattern.permute.xlu1 %v610_v4  ;;  %586 = vset.pattern.permute.xlu0 %v610_v4  ;;  %v41_v5 = vld [vmem:[%s820_s0 + $0x10] sm:$0xff]  ;;  %v40_v6 = vld [vmem:[%s820_s0 + $0x8] sm:$0xff]  ;;  %v46_v7 = vld [vmem:[%s822_s2 + $0x18] sm:$0xff] }
   0x5   :  { %544 = vmatprep.subr.mxu0 %v42_v1  ;;  %576 = vmatprep.subr.mxu1 %v42_v1  ;;  %v44_v8 = vld [vmem:[%s822_s2 + $0x8] sm:$0xff]  ;;  %v39_v9 = vld [vmem:[%s820_s0] sm:$0xff]  ;;  %v25_v16 = vld [vmem:[%s821_s1 + $0x10] sm:$0xff] }
   0x6   :  { %71 = vperm.xlu1 %587, %v45_v2   ;;  %61 = vperm.xlu0 %586, %v43_v3   ;;  %v23_v10 = vld [vmem:[%s821_s1] sm:$0xff]  ;;  %v24_v12 = vld [vmem:[%s821_s1 + $0x8] sm:$0xff]  ;;  %v33_v17 = vld [vmem:[%s821_s1 + $0x50] sm:$0xff] }
   0x7   :  { %545 = vmatpush3.msra.mxu0 %v42_v1  ;;  %580 = vmatpush3.msra.mxu1 %v42_v1  ;;  %v31_v11 = vld [vmem:[%s821_s1 + $0x40] sm:$0xff]  ;;  %v32_v13 = vld [vmem:[%s821_s1 + $0x48] sm:$0xff]  ;;  %v26_v18 = vld [vmem:[%s821_s1 + $0x18] sm:$0xff] }
   0x8   :  { %546 = vmatprep.subr.mxu0 %v41_v5  ;;  %577 = vmatprep.subr.mxu1 %v41_v5  ;;  %v48_v14 = vld [vmem:[%s822_s2 + $0x28] sm:$0xff]  ;;  %v47_v15 = vld [vmem:[%s822_s2 + $0x20] sm:$0xff]  ;;  %v34_v19 = vld [vmem:[%s821_s1 + $0x58] sm:$0xff] }
   0x9   :  { %547 = vmatpush3.msra.mxu0 %v41_v5  ;;  %581 = vmatpush3.msra.mxu1 %v41_v5  ;;  %v350_v20 = vld [vmem:[%s823_s3 + $0x8] sm:$0xff]  ;;  %v349_v21 = vld [vmem:[%s823_s3] sm:$0xff] }
   0xa   :  { %548 = vmatprep.subr.mxu0 %v40_v6  ;;  %578 = vmatprep.subr.mxu1 %v40_v6  ;;  %v27_v22 = vld [vmem:[%s821_s1 + $0x20] sm:$0xff] }
   0xb   :  { %76 = vperm.xlu1 %587, %v46_v7   ;;  %66 = vperm.xlu0 %586, %v44_v8   ;;  %v35_v23 = vld [vmem:[%s821_s1 + $0x60] sm:$0xff] }
   0xc   :  { %549 = vmatpush3.msra.mxu0 %v40_v6  ;;  %582 = vmatpush3.msra.mxu1 %v40_v6 }
   0xd   :  { %550 = vmatprep.subr.mxu0 %v39_v9  ;;  %579 = vmatprep.subr.mxu1 %v39_v9 }
   0xe   :  { %551 = vmatpush3.msra.mxu0 %v39_v9  ;;  %583 = vmatpush3.msra.mxu1 %v39_v9 }
   0xf   :  { %552 = vmatprep.mubr.msk.f32.mxu0 %vm139_vm0, %v23_v10  ;;  %564 = vmatprep.mubr.msk.f32.mxu1 %vm139_vm0, %v31_v11 }
  0x10   :  { %553 = vmatmul.mubr.msk.f32.vlgmr.msra.gmra.mxu0 %vm139_vm0, %v24_v12  ;;  %565 = vmatmul.mubr.msk.f32.vlgmr.msra.gmra.mxu1 %vm139_vm0, %v32_v13 }
  0x11   :  { %86 = vperm.xlu1 %587, %v48_v14   ;;  %81 = vperm.xlu0 %586, %v47_v15  }
  0x12   :  { %555 = vmatprep.mubr.msk.f32.mxu0 %vm139_vm0, %v25_v16  ;;  %567 = vmatprep.mubr.msk.f32.mxu1 %vm139_vm0, %v33_v17 }
  0x14   :  { %556 = vmatmul.mubr.msk.f32.gmra.mxu0 %vm139_vm0, %v26_v18  ;;  %568 = vmatmul.mubr.msk.f32.gmra.mxu1 %vm139_vm0, %v34_v19 }
  0x15   :  { %12 = vsyncpa [#allocation4], 0  ;;  %372 = vperm.xlu1 %587, %v350_v20   ;;  %367 = vperm.xlu0 %586, %v349_v21   ;;  %v28_v24 = vld [vmem:[%s821_s1 + $0x28] sm:$0xff]  ;;  %v352_v26 = vld [vmem:[%s823_s3 + $0x18] sm:$0xff] }
  0x16   :  { %v36_v25 = vld [vmem:[%s821_s1 + $0x68] sm:$0xff]  ;;  %558 = vmatprep.mubr.msk.f32.mxu0 %vm139_vm0, %v27_v22  ;;  %570 = vmatprep.mubr.msk.f32.mxu1 %vm139_vm0, %v35_v23  ;;  %v351_v27 = vld [vmem:[%s823_s3 + $0x10] sm:$0xff]  ;;  %v30_v30 = vld [vmem:[%s821_s1 + $0x38] sm:$0xff] }
  0x17   :  { %v29_v28 = vld [vmem:[%s821_s1 + $0x30] sm:$0xff]  ;;  %v38_v31 = vld [vmem:[%s821_s1 + $0x78] sm:$0xff]  ;;  %v353_v32 = vld [vmem:[%s823_s3 + $0x20] sm:$0xff] }
  0x18   :  { %v37_v29 = vld [vmem:[%s821_s1 + $0x70] sm:$0xff]  ;;  %559 = vmatmul.mubr.msk.f32.gmra.mxu0 %vm139_vm0, %v28_v24  ;;  %571 = vmatmul.mubr.msk.f32.gmra.mxu1 %vm139_vm0, %v36_v25  ;;  %v354_v34 = vld [vmem:[%s823_s3 + $0x28] sm:$0xff]  ;;  %v50_v35 = vld [vmem:[%s822_s2 + $0x38] sm:$0xff] }
  0x19   :  { %382 = vperm.xlu1 %587, %v352_v26   ;;  %377 = vperm.xlu0 %586, %v351_v27   ;;  %v49_v33 = vld [vmem:[%s822_s2 + $0x30] sm:$0xff]  ;;  %v51_v37 = vld [vmem:[%s822_s2 + $0x40] sm:$0xff]  ;;  %v356_v38 = vld [vmem:[%s823_s3 + $0x38] sm:$0xff] }
  0x1a   :  { %561 = vmatprep.mubr.msk.f32.mxu0 %vm139_vm0, %v29_v28  ;;  %573 = vmatprep.mubr.msk.f32.mxu1 %vm139_vm0, %v37_v29  ;;  %v355_v36 = vld [vmem:[%s823_s3 + $0x30] sm:$0xff]  ;;  %v52_v39 = vld [vmem:[%s822_s2 + $0x48] sm:$0xff]  ;;  %v357_v40 = vld [vmem:[%s823_s3 + $0x40] sm:$0xff] }
  0x1b   :  { %v53_v41 = vld [vmem:[%s822_s2 + $0x50] sm:$0xff]  ;;  %v358_v42 = vld [vmem:[%s823_s3 + $0x48] sm:$0xff]  ;;  %v54_v43 = vld [vmem:[%s822_s2 + $0x58] sm:$0xff] }
  0x1c   :  { %562 = vmatmul.mubr.msk.f32.gmra.mxu0 %vm139_vm0, %v30_v30  ;;  %574 = vmatmul.mubr.msk.f32.gmra.mxu1 %vm139_vm0, %v38_v31  ;;  %v359_v44 = vld [vmem:[%s823_s3 + $0x50] sm:$0xff]  ;;  %v55_v45 = vld [vmem:[%s822_s2 + $0x60] sm:$0xff]  ;;  %v360_v46 = vld [vmem:[%s823_s3 + $0x58] sm:$0xff] }
  0x1d   :  { %387 = vperm.xlu1 %587, %v353_v32   ;;  %91 = vperm.xlu0 %586, %v49_v33   ;;  %v56_v47 = vld [vmem:[%s822_s2 + $0x68] sm:$0xff]  ;;  %v361_v48 = vld [vmem:[%s823_s3 + $0x60] sm:$0xff]  ;;  %v57_v49 = vld [vmem:[%s822_s2 + $0x70] sm:$0xff] }
  0x1e   :  { %v362_v50 = vld [vmem:[%s823_s3 + $0x68] sm:$0xff]  ;;  %v58_v51 = vld [vmem:[%s822_s2 + $0x78] sm:$0xff]  ;;  %v363_v53 = vld [vmem:[%s823_s3 + $0x70] sm:$0xff]  ;;  %s611_s2 = smov [#allocation3]  }
  0x1f   :  { %v364_v52 = vld [vmem:[%s823_s3 + $0x78] sm:$0xff]  ;;  %v482_v54 = vld [vmem:[#allocation2] sm:$0x1]  ;;  %s500_s3 = sshll.u32 %s611_s2, 4  ;;  %s501_s3 = int_to_ptr.vmem [resolvable:$true] %s500_s3 }
  0x20   :  { %s588_s15 = scalar_lea.vmem %s501_s3, 16  ;;  %s592_s0 = scalar_lea.vmem %s501_s3, 32 }
  0x21   :  { %392 = vperm.xlu1 %587, %v354_v34   ;;  %96 = vperm.xlu0 %586, %v50_v35   ;;  %p589_p0 = scmp.ne.s32.totalorder %s501_s3, %s588_s15  ;;  %p593_p1 = scmp.lt.s32.totalorder %s501_s3, %s501_s3 }
  0x22   :  { %p594_p2 = scmp.lt.s32.totalorder %s592_s0, %s588_s15 }
  0x24   :  { %p595_p3 = por %p594_p2, %p593_p1 }
  0x25   :  { %397 = vperm.xlu1 %587, %v355_v36   ;;  %101 = vperm.xlu0 %586, %v51_v37  }
  0x26   :  { %p596_p4 = pnand %p595_p3, %p589_p0 }
  0x29   :  { %402 = vperm.xlu1 %587, %v356_v38   ;;  %106 = vperm.xlu0 %586, %v52_v39  }
  0x2d   :  { %407 = vperm.xlu1 %587, %v357_v40   ;;  %111 = vperm.xlu0 %586, %v53_v41  }
  0x31   :  { %412 = vperm.xlu1 %587, %v358_v42   ;;  %116 = vperm.xlu0 %586, %v54_v43  }
  0x35   :  { %417 = vperm.xlu1 %587, %v359_v44   ;;  %121 = vperm.xlu0 %586, %v55_v45  }
  0x39   :  { %422 = vperm.xlu1 %587, %v360_v46   ;;  %126 = vperm.xlu0 %586, %v56_v47  }
  0x3d   :  { %427 = vperm.xlu1 %587, %v361_v48   ;;  %131 = vperm.xlu0 %586, %v57_v49  }
  0x41   :  { %432 = vperm.xlu1 %587, %v362_v50   ;;  %136 = vperm.xlu0 %586, %v58_v51  }
  0x45   :  { %442 = vperm.xlu1 %587, %v364_v52   ;;  %437 = vperm.xlu0 %586, %v363_v53  }
  0x49   :  { %485 = vperm.xlu0 %586, %v482_v54  }
  0x81   :  { %v62_v55 = vpop.permute.xlu0 %61  ;;  %v72_v56 = vpop.permute.xlu1 %71 }
  0x86   :  { %v67_v57 = vpop.permute.xlu0 %66  ;;  %v77_v58 = vpop.permute.xlu1 %76 }
  0x8c   :  { %v82_v59 = vpop.permute.xlu0 %81  ;;  %v87_v60 = vpop.permute.xlu1 %86 }
  0x90   :  { %v368_v61 = vpop.permute.xlu0 %367  ;;  %v373_v62 = vpop.permute.xlu1 %372 }
  0x94   :  { %v378_v63 = vpop.permute.xlu0 %377  ;;  %v383_v0 = vpop.permute.xlu1 %382 }
  0x98   :  { %v92_v1 = vpop.permute.xlu0 %91  ;;  %v388_v2 = vpop.permute.xlu1 %387 }
  0x9c   :  { %v97_v3 = vpop.permute.xlu0 %96  ;;  %v393_v4 = vpop.permute.xlu1 %392 }
  0xa0   :  { %v102_v5 = vpop.permute.xlu0 %101  ;;  %v398_v6 = vpop.permute.xlu1 %397 }
  0xa4   :  { %v107_v7 = vpop.permute.xlu0 %106  ;;  %v403_v8 = vpop.permute.xlu1 %402 }
  0xa8   :  { %v112_v9 = vpop.permute.xlu0 %111  ;;  %v408_v10 = vpop.permute.xlu1 %407 }
  0xac   :  { %v117_v16 = vpop.permute.xlu0 %116  ;;  %v413_v20 = vpop.permute.xlu1 %412 }
  0xb0   :  { %v122_v33 = vpop.permute.xlu0 %121  ;;  %v418_v35 = vpop.permute.xlu1 %417 }
  0xb4   :  { %v127_v51 = vpop.permute.xlu0 %126 }
  0xd0   :  { %v554_v11 = vpop.f32.mrf.mxu0  ;;  %v566_v12 = vpop.f32.mrf.mxu1 }
  0xd1   :  { %v260_v13 = vadd.f32 %v554_v11, %v67_v57  ;;  %v300_v52 = vadd.f32 %v566_v12, %v107_v7 }
  0xd2   :  { %v254_v14 = vpop.f32.mrf.mxu0  ;;  %v294_v15 = vpop.f32.mrf.mxu1 }
  0xd3   :  { %v255_v17 = vadd.f32 %v254_v14, %v62_v55  ;;  %v334_v21 = vmax.f32 %v260_v13, 0.0  ;;  %v295_v47 = vadd.f32 %v294_v15, %v102_v5 }
  0xd4   :  { %v557_v18 = vpop.f32.mrf.mxu0  ;;  %v569_v19 = vpop.f32.mrf.mxu1 }
  0xd5   :  { %v333_v22 = vmax.f32 %v255_v17, 0.0  ;;  %v270_v23 = vadd.f32 %v557_v18, %v77_v58  ;;  %v446_v30 = vmul.f32 %v373_v62, %v334_v21  ;;  %v423_v58 = vpop.permute.xlu1 %422 }
  0xd6   :  { %v264_v24 = vpop.f32.mrf.mxu0  ;;  %v304_v28 = vpop.f32.mrf.mxu1 }
  0xd7   :  { %v445_v25 = vmul.f32 %v368_v61, %v333_v22  ;;  %v265_v26 = vadd.f32 %v264_v24, %v72_v56  ;;  %v336_v27 = vmax.f32 %v270_v23, 0.0 }
  0xd8   :  { %v560_v29 = vpop.f32.mrf.mxu0  ;;  %v572_v40 = vpop.f32.mrf.mxu1 }
  0xd9   :  { %v335_v31 = vmax.f32 %v265_v26, 0.0  ;;  %v280_v32 = vadd.f32 %v560_v29, %v87_v60  ;;  %v461_v36 = vadd.f32 %v446_v30, %v445_v25  ;;  %v448_v39 = vmul.f32 %v383_v0, %v336_v27  ;;  %v428_v12 = vpop.permute.xlu1 %427 }
  0xda   :  { %v274_v34 = vpop.f32.mrf.mxu0  ;;  %v314_v53 = vpop.f32.mrf.mxu1  ;;  %v305_v60 = vadd.f32 %v304_v28, %v112_v9  ;;  %v342_v0 = vmax.f32 %v300_v52, 0.0  ;;  %v320_v18 = vadd.f32 %v572_v40, %v127_v51 }
  0xdb   :  { %v447_v37 = vmul.f32 %v378_v63, %v335_v31  ;;  %v275_v38 = vadd.f32 %v274_v34, %v82_v59  ;;  %v338_v43 = vmax.f32 %v280_v32, 0.0  ;;  %v341_v59 = vmax.f32 %v295_v47, 0.0 }
  0xdc   :  { %v563_v41 = vpop.f32.mrf.mxu0  ;;  %v575_v63 = vpop.f32.mrf.mxu1  ;;  %v315_v14 = vadd.f32 %v314_v53, %v122_v33  ;;  %v454_v15 = vmul.f32 %v413_v20, %v342_v0 }
  0xdd   :  { %v462_v42 = vadd.f32 %v461_v36, %v447_v37  ;;  %v337_v44 = vmax.f32 %v275_v38, 0.0  ;;  %v290_v45 = vadd.f32 %v563_v41, %v97_v3  ;;  %v450_v54 = vmul.f32 %v393_v4, %v338_v43  ;;  %v433_v26 = vpop.permute.xlu1 %432 }
  0xde   :  { %v284_v46 = vpop.f32.mrf.mxu0  ;;  %v310_v3 = vadd.f32 %v569_v19, %v117_v16  ;;  %v453_v13 = vmul.f32 %v408_v10, %v341_v59  ;;  %v324_v4 = vpop.f32.mrf.mxu1  ;;  %v345_v9 = vmax.f32 %v315_v14, 0.0  ;;  %v346_v16 = vmax.f32 %v320_v18, 0.0 }
  0xdf   :  { %v449_v48 = vmul.f32 %v388_v2, %v337_v44  ;;  %v463_v49 = vadd.f32 %v462_v42, %v448_v39  ;;  %v285_v50 = vadd.f32 %v284_v46, %v92_v1  ;;  %v340_v56 = vmax.f32 %v290_v45, 0.0  ;;  %v132_v2 = vpop.permute.xlu0 %131 }
  0xe0   :  { %v343_v1 = vmax.f32 %v305_v60, 0.0  ;;  %v344_v17 = vmax.f32 %v310_v3, 0.0  ;;  %v325_v23 = vadd.f32 %v324_v4, %v132_v2  ;;  %v457_v10 = vmul.f32 %v428_v12, %v345_v9 }
  0xe1   :  { %v464_v55 = vadd.f32 %v463_v49, %v449_v48  ;;  %v339_v57 = vmax.f32 %v285_v50, 0.0  ;;  %v452_v11 = vmul.f32 %v403_v8, %v340_v56  ;;  %v458_v29 = vmul.f32 %v433_v26, %v346_v16  ;;  %v443_v34 = vpop.permute.xlu1 %442 }
  0xe2   :  { %v455_v22 = vmul.f32 %v418_v35, %v343_v1  ;;  %v456_v25 = vmul.f32 %v423_v58, %v344_v17  ;;  %v347_v27 = vmax.f32 %v325_v23, 0.0  ;;  %v488_v37 = vlaneseq }
  0xe3   :  { %v451_v61 = vmul.f32 %v398_v6, %v339_v57  ;;  %v465_v62 = vadd.f32 %v464_v55, %v450_v54  ;;  %v137_v24 = vpop.permute.xlu0 %136 }
  0xe4   :  { %v330_v8 = vadd.f32 %v575_v63, %v137_v24  ;;  %v489_v40 = vshrl.u32 %v488_v37, 7 }
  0xe5   :  { %v466_v5 = vadd.f32 %v465_v62, %v451_v61 }
  0xe6   :  { %v348_v30 = vmax.f32 %v330_v8, 0.0  ;;  %v490_v43 = vsub.s32 0, %v489_v40 }
  0xe7   :  { %v467_v7 = vadd.f32 %v466_v5, %v452_v11  ;;  %v438_v20 = vpop.permute.xlu0 %437 }
  0xe8   :  { %v459_v32 = vmul.f32 %v438_v20, %v347_v27  ;;  %v460_v35 = vmul.f32 %v443_v34, %v348_v30 }
  0xe9   :  { %v468_v21 = vadd.f32 %v467_v7, %v453_v13 }
  0xeb   :  { %v469_v6 = vadd.f32 %v468_v21, %v454_v15  ;;  %v486_v45 = vpop.permute.xlu0 %485 }
  0xec   :  { %v491_v47 = vrot.slane %v486_v45, %v490_v43 }
  0xed   :  { %v470_v19 = vadd.f32 %v469_v6, %v455_v22 }
  0xef   :  { %v471_v28 = vadd.f32 %v470_v19, %v456_v25 }
  0xf1   :  { %v472_v31 = vadd.f32 %v471_v28, %v457_v10 }
  0xf3   :  { %v473_v33 = vadd.f32 %v472_v31, %v458_v29 }
  0xf5   :  { %v474_v36 = vadd.f32 %v473_v33, %v459_v32 }
  0xf7   :  { %v475_v38 = vadd.f32 %v474_v36, %v460_v35 }
  0xf9   :  { %v476_v39 = vrot.slane %v475_v38, 4 }
  0xfb   :  { %v477_v41 = vadd.f32 %v476_v39, %v475_v38 }
  0xfd   :  { %v478_v42 = vrot.slane %v477_v41, 2 }
  0xff   :  { %v479_v44 = vadd.f32 %v478_v42, %v477_v41 }
 0x101   :  { %v480_v46 = vrot.slane %v479_v44, 1 }
 0x103   :  { %v481_v48 = vadd.f32 %v480_v46, %v479_v44 }
 0x105   :  { %v492_v49 = vadd.f32 %v491_v47, %v481_v48 }
 0x107   :  { %493 = vst [vmem:[#allocation3] sm:$0x1] %v492_v49 }
 0x108   :  { %599 = shalt.err (!%p596_p4)
}
 0x109   :  { %503 = dma.vmem_to_hbm [thread:$0]  %s501_s3, 16, %s825_s5, [#allocation4]  }
 0x10a   :  { %608 = dma.done.wait [#allocation4], 16  }
 0x10b   :  { %609 = vsyncadd [#allocation4], 4294967280 }
 0x10c   :  { %507 = vsyncpa [#allocation4], 1 }

</bundles_post_ra>
